<compile_context>
chip_gen: v6e
topology: v6e:2x2x1
jax: 0.10.0
libtpu: 0.0.40
codegen_flags: <defaults>
</compile_context>

<pallas_src>
import jax
import jax.numpy as jnp
from jax.experimental import pallas as pl
from jax.experimental.pallas import tpu as pltpu

LANE = 128
SUBLANE = 8
H0 = 128   # fc0 output width
H1 = 64    # fc1 output width


def _round_up(n, m):
    return (n + m - 1) // m * m


def critic_kernel(x_ref, w0_ref, b0_ref, w1_ref, b1_ref, w2_ref, b2_ref, q_ref):
    # fc0 + ReLU : (TB, Dp)bf16 @ (Dp, 128)bf16 -> f32 accum; bias/relu in f32.
    h0 = jnp.dot(x_ref[...], w0_ref[...], preferred_element_type=jnp.float32)
    h0 = jnp.maximum(h0 + b0_ref[...], 0.0)
    # dropout0: identity (eval mode)

    # fc1 + ReLU : cast activations to bf16 for the MXU, accumulate in f32.
    h1 = jnp.dot(h0.astype(jnp.bfloat16), w1_ref[...],
                 preferred_element_type=jnp.float32)
    h1 = jnp.maximum(h1 + b1_ref[...], 0.0)
    # dropout1: identity (eval mode)

    # fc2 (K=64, N=1): VPU multiply + lane reduction (avoids an N=1 MXU matmul).
    q = jnp.sum(h1 * w2_ref[...], axis=-1, keepdims=True) + b2_ref[...]
    q_ref[...] = q.astype(q_ref.dtype)


def critic_forward(x, params, *, block_b=1024):
    """x: [B, obs_dim + action_dim] float32 -> q: [B, 1] float32."""
    w0, b0, w1, b1, w2, b2 = params
    B, d_in = x.shape
    d_pad = _round_up(d_in, LANE)

    # Lane-align the feature dim; bf16 matmul operands (accumulation is f32).
    x_p = jnp.zeros((B, d_pad), jnp.bfloat16).at[:, :d_in].set(
        x.astype(jnp.bfloat16))
    w0_p = jnp.zeros((d_pad, H0), jnp.bfloat16).at[:d_in, :].set(
        w0.astype(jnp.bfloat16))
    w1_b = w1.astype(jnp.bfloat16)
    w2_row = w2.reshape(1, H1).astype(jnp.float32)
    b0_r = b0.reshape(1, H0).astype(jnp.float32)
    b1_r = b1.reshape(1, H1).astype(jnp.float32)
    b2_r = b2.reshape(1, 1).astype(jnp.float32)

    # Batch tile: big enough to pipeline well, small enough for v7x VMEM.
    tb = min(block_b, _round_up(B, SUBLANE))
    n_tiles = pl.cdiv(B, tb)

    const2 = lambda i: (0, 0)  # parameters stay resident across batch tiles

    flops = 2 * B * (d_pad * H0 + H0 * H1 + H1)
    bytes_accessed = (x_p.size * 2 + w0_p.size * 2 + w1_b.size * 2
                      + (w2_row.size + b0_r.size + b1_r.size + b2_r.size) * 4
                      + B * 4)

    return pl.pallas_call(
        critic_kernel,
        out_shape=jax.ShapeDtypeStruct((B, 1), jnp.float32),
        grid=(n_tiles,),
        in_specs=[
            pl.BlockSpec((tb, d_pad), lambda i: (i, 0)),  # x tile (pipelined)
            pl.BlockSpec((d_pad, H0), const2),            # w0 (resident)
            pl.BlockSpec((1, H0), const2),                # b0
            pl.BlockSpec((H0, H1), const2),               # w1
            pl.BlockSpec((1, H1), const2),                # b1
            pl.BlockSpec((1, H1), const2),                # w2 as a row
            pl.BlockSpec((1, 1), const2),                 # b2
        ],
        out_specs=pl.BlockSpec((tb, 1), lambda i: (i, 0)),
        compiler_params=pltpu.CompilerParams(
            dimension_semantics=("parallel",)),
        cost_estimate=pl.CostEstimate(
            flops=flops, transcendentals=0, bytes_accessed=bytes_accessed),
    )(x_p, w0_p, b0_r, w1_b, b1_r, w2_row, b2_r)


def init_critic_params(key, obs_dim, action_dim):
    """Deterministic init matching torch.nn.Linear shapes (stored as [in, out])."""
    d_in = obs_dim + action_dim
    sizes = [(d_in, H0), (H0, H1), (H1, 1)]
    params = []
    for fan_in, fan_out in sizes:
        kw, kb, key = jax.random.split(key, 3)
        bound = 1.0 / jnp.sqrt(jnp.float32(fan_in))
        w = jax.random.uniform(kw, (fan_in, fan_out), jnp.float32, -bound, bound)
        b = jax.random.uniform(kb, (1, fan_out), jnp.float32, -bound, bound)
        params += [w, b]
    return tuple(params)


def critic_reference(x, params):
    """Plain-JAX f32 reference for correctness checking."""
    w0, b0, w1, b1, w2, b2 = params
    h0 = jnp.maximum(x @ w0 + b0, 0.0)
    h1 = jnp.maximum(h0 @ w1 + b1, 0.0)
    return h1 @ w2 + b2


if __name__ == "__main__":
    key = jax.random.PRNGKey(0)
    obs_dim, action_dim, batch = 8, 4, 4

    kx, kp = jax.random.split(key)
    x = jax.random.normal(kx, (batch, obs_dim + action_dim), jnp.float32)
    params = init_critic_params(kp, obs_dim, action_dim)

    q = critic_forward(x, params)
    q = jax.block_until_ready(q)

    q_ref = critic_reference(x, params)
    assert q.shape == (batch, 1)
    # bf16 MXU operands (f32 accumulation) vs f32 reference -> loosened tolerance.
    assert jnp.allclose(q, q_ref, atol=3e-2, rtol=3e-2), "mismatch vs reference"

    print("KERNEL_OK")
</pallas_src>

<mosaic_0001>
module attributes {stable_mosaic.version = 11 : i64} {
  func.func @critic_kernel(%arg0: i32, %arg1: memref<8x128xbf16, #tpu.memory_space<vmem>>, %arg2: memref<128x128xbf16, #tpu.memory_space<vmem>>, %arg3: memref<1x128xf32, #tpu.memory_space<vmem>>, %arg4: memref<128x64xbf16, #tpu.memory_space<vmem>>, %arg5: memref<1x64xf32, #tpu.memory_space<vmem>>, %arg6: memref<1x64xf32, #tpu.memory_space<vmem>>, %arg7: memref<1x1xf32, #tpu.memory_space<vmem>>, %arg8: memref<8x1xf32, #tpu.memory_space<vmem>>) attributes {dimension_semantics = [#tpu.dimension_semantics<parallel>], iteration_bounds = array<i64: 1>, scalar_prefetch = 0 : i64, scratch_operands = 0 : i64, tpu.core_type = #tpu.core_type<tc>, window_params = [{transform_indices = @transform_0, window_bounds = array<i64: 8, 128>}, {pipeline_mode = #tpu.pipeline_mode<synchronous>, transform_indices = @transform_1, window_bounds = array<i64: 128, 128>}, {pipeline_mode = #tpu.pipeline_mode<synchronous>, transform_indices = @transform_2, window_bounds = array<i64: 1, 128>}, {pipeline_mode = #tpu.pipeline_mode<synchronous>, transform_indices = @transform_3, window_bounds = array<i64: 128, 64>}, {pipeline_mode = #tpu.pipeline_mode<synchronous>, transform_indices = @transform_4, window_bounds = array<i64: 1, 64>}, {pipeline_mode = #tpu.pipeline_mode<synchronous>, transform_indices = @transform_5, window_bounds = array<i64: 1, 64>}, {pipeline_mode = #tpu.pipeline_mode<synchronous>, transform_indices = @transform_6, window_bounds = array<i64: 1, 1>}, {transform_indices = @transform_7, window_bounds = array<i64: 8, 1>}]} {
    %c0 = arith.constant 0 : index
    %c0_0 = arith.constant 0 : index
    %0 = vector.load %arg1[%c0, %c0_0] : memref<8x128xbf16, #tpu.memory_space<vmem>>, vector<8x128xbf16>
    %c0_1 = arith.constant 0 : index
    %c0_2 = arith.constant 0 : index
    %1 = vector.load %arg2[%c0_1, %c0_2] : memref<128x128xbf16, #tpu.memory_space<vmem>>, vector<128x128xbf16>
    %cst = arith.constant dense<0.000000e+00> : vector<8x128xf32>
    %2 = tpu.matmul %0, %1, %cst {dimension_numbers = #tpu.dot_dimension_numbers<[1], [0], [0], [1], [0, 0, 1, 1], [], []>} : vector<8x128xbf16>, vector<128x128xbf16>, vector<8x128xf32> -> vector<8x128xf32>
    %c0_3 = arith.constant 0 : index
    %c0_4 = arith.constant 0 : index
    %3 = vector.load %arg3[%c0_3, %c0_4] : memref<1x128xf32, #tpu.memory_space<vmem>>, vector<1x128xf32>
    %4 = vector.broadcast %3 : vector<1x128xf32> to vector<8x128xf32>
    %5 = arith.addf %2, %4 : vector<8x128xf32>
    %cst_5 = arith.constant 0.000000e+00 : f32
    %6 = vector.broadcast %cst_5 : f32 to vector<8x128xf32>
    %7 = arith.maximumf %5, %6 : vector<8x128xf32>
    %8 = arith.truncf %7 : vector<8x128xf32> to vector<8x128xbf16>
    %c0_6 = arith.constant 0 : index
    %c0_7 = arith.constant 0 : index
    %9 = vector.load %arg4[%c0_6, %c0_7] : memref<128x64xbf16, #tpu.memory_space<vmem>>, vector<128x64xbf16>
    %cst_8 = arith.constant dense<0.000000e+00> : vector<8x64xf32>
    %10 = tpu.matmul %8, %9, %cst_8 {dimension_numbers = #tpu.dot_dimension_numbers<[1], [0], [0], [1], [0, 0, 1, 1], [], []>} : vector<8x128xbf16>, vector<128x64xbf16>, vector<8x64xf32> -> vector<8x64xf32>
    %c0_9 = arith.constant 0 : index
    %c0_10 = arith.constant 0 : index
    %11 = vector.load %arg5[%c0_9, %c0_10] : memref<1x64xf32, #tpu.memory_space<vmem>>, vector<1x64xf32>
    %12 = vector.broadcast %11 : vector<1x64xf32> to vector<8x64xf32>
    %13 = arith.addf %10, %12 : vector<8x64xf32>
    %cst_11 = arith.constant 0.000000e+00 : f32
    %14 = vector.broadcast %cst_11 : f32 to vector<8x64xf32>
    %15 = arith.maximumf %13, %14 : vector<8x64xf32>
    %c0_12 = arith.constant 0 : index
    %c0_13 = arith.constant 0 : index
    %16 = vector.load %arg6[%c0_12, %c0_13] : memref<1x64xf32, #tpu.memory_space<vmem>>, vector<1x64xf32>
    %17 = vector.broadcast %16 : vector<1x64xf32> to vector<8x64xf32>
    %18 = arith.mulf %15, %17 : vector<8x64xf32>
    %cst_14 = arith.constant dense<0.000000e+00> : vector<8xf32>
    %19 = vector.multi_reduction <add>, %18, %cst_14 [1] : vector<8x64xf32> to vector<8xf32>
    %20 = vector.shape_cast %19 : vector<8xf32> to vector<8x1xf32>
    %c0_15 = arith.constant 0 : index
    %c0_16 = arith.constant 0 : index
    %21 = vector.load %arg7[%c0_15, %c0_16] : memref<1x1xf32, #tpu.memory_space<vmem>>, vector<1x1xf32>
    %22 = vector.broadcast %21 : vector<1x1xf32> to vector<8x1xf32>
    %23 = arith.addf %20, %22 : vector<8x1xf32>
    %c0_17 = arith.constant 0 : index
    %c0_18 = arith.constant 0 : index
    %24 = vector.load %arg8[%c0_17, %c0_18] : memref<8x1xf32, #tpu.memory_space<vmem>>, vector<8x1xf32>
    tpu.vector_store %arg8[%c0_17, %c0_18], %23 {strides = array<i32>} : memref<8x1xf32, #tpu.memory_space<vmem>>, vector<8x1xf32>,
    return
  }
  func.func @transform_0(%arg0: i32) -> (i32, i32) {
    %c0_i32 = arith.constant 0 : i32
    %c0_i32_0 = arith.constant 0 : i32
    return %arg0, %c0_i32 : i32, i32
  }
  func.func @transform_1(%arg0: i32) -> (i32, i32) {
    %c0_i32 = arith.constant 0 : i32
    %c0_i32_0 = arith.constant 0 : i32
    %c0_i32_1 = arith.constant 0 : i32
    return %c0_i32, %c0_i32_0 : i32, i32
  }
  func.func @transform_2(%arg0: i32) -> (i32, i32) {
    %c0_i32 = arith.constant 0 : i32
    %c0_i32_0 = arith.constant 0 : i32
    %c0_i32_1 = arith.constant 0 : i32
    return %c0_i32, %c0_i32_0 : i32, i32
  }
  func.func @transform_3(%arg0: i32) -> (i32, i32) {
    %c0_i32 = arith.constant 0 : i32
    %c0_i32_0 = arith.constant 0 : i32
    %c0_i32_1 = arith.constant 0 : i32
    return %c0_i32, %c0_i32_0 : i32, i32
  }
  func.func @transform_4(%arg0: i32) -> (i32, i32) {
    %c0_i32 = arith.constant 0 : i32
    %c0_i32_0 = arith.constant 0 : i32
    %c0_i32_1 = arith.constant 0 : i32
    return %c0_i32, %c0_i32_0 : i32, i32
  }
  func.func @transform_5(%arg0: i32) -> (i32, i32) {
    %c0_i32 = arith.constant 0 : i32
    %c0_i32_0 = arith.constant 0 : i32
    %c0_i32_1 = arith.constant 0 : i32
    return %c0_i32, %c0_i32_0 : i32, i32
  }
  func.func @transform_6(%arg0: i32) -> (i32, i32) {
    %c0_i32 = arith.constant 0 : i32
    %c0_i32_0 = arith.constant 0 : i32
    %c0_i32_1 = arith.constant 0 : i32
    return %c0_i32, %c0_i32_0 : i32, i32
  }
  func.func @transform_7(%arg0: i32) -> (i32, i32) {
    %c0_i32 = arith.constant 0 : i32
    %c0_i32_0 = arith.constant 0 : i32
    return %arg0, %c0_i32 : i32, i32
  }
}

</mosaic_0001>

<bundles_post_ra>
// kernel: tpu_custom_call.1
= control target key start
LH: loop header
LB: loop body
LE: loop exit
PB: predicated region body
PF: predicated region fallthrough
CT: control target
= control target key end

     0   :  { %s539_s0 = inlined_call_operand.vmem [shape: bf16[4,128], index: 0, kind: input, shape index: {}]   ;;  %s540_s1 = inlined_call_operand.vmem [shape: bf16[128,128], index: 1, kind: input, shape index: {}]   ;;  %s541_s2 = inlined_call_operand.vmem [shape: f32[1,128], index: 2, kind: input, shape index: {}]   ;;  %s542_s3 = inlined_call_operand.vmem [shape: bf16[128,64], index: 3, kind: input, shape index: {}]   ;;  %s543_s4 = inlined_call_operand.vmem [shape: f32[1,64], index: 4, kind: input, shape index: {}]   ;;  %s544_s5 = inlined_call_operand.vmem [shape: f32[1,64], index: 5, kind: input, shape index: {}]   ;;  %s545_s6 = inlined_call_operand.<no memory space> [shape: f32[1,1], index: 6, kind: input, shape index: {}]   ;;  %s546_s7 = inlined_call_operand.vmem [shape: f32[4,1], index: 7, kind: output, shape index: {}]  }
   0x1   :  { %v12_v0 = vstv %s545_s6 }
   0x2   :  { %13 = vst [vmem:[#allocation2] sm:$0x1] %v12_v0 }
   0x3   :  { %v411_v1 = vld [vmem:[%s540_s1 + $0x38] sm:$0xff]   ;;  %v427_v2 = vmov 0.0   ;;  %v412_v3 = vld [vmem:[%s540_s1 + $0x30] sm:$0xff]   ;;  %vm428_vm0 = vmmov 0   ;;  %v413_v4 = vld [vmem:[%s540_s1 + $0x28] sm:$0xff]   ;;  %v60_v12 = vlaneseq  ;;  %vm275_vm1 = vcmask 523264  }
   0x4   :  { %368 = vmatprep.subr.bf16.mxu0 %v427_v2  ;;  %388 = vmatprep.subr.bf16.mxu1 %v427_v2  ;;  %v419_v5 = vld [vmem:[%s542_s3 + $0x38] sm:$0xff]   ;;  %v414_v6 = vld [vmem:[%s540_s1 + $0x20] sm:$0xff]   ;;  %v420_v7 = vld [vmem:[%s542_s3 + $0x30] sm:$0xff]   ;;  %v429_v10 = vmov 1983009808   ;;  %vm287_vm2 = vcmask 7168  }
   0x5   :  { %369 = vmatpush3.bf16.msra.mxu0 %v411_v1  ;;  %384 = vmatprep.mubr.msk.bf16.mxu0 %vm428_vm0, %v427_v2  ;;  %v415_v8 = vld [vmem:[%s540_s1 + $0x18] sm:$0xff]   ;;  %v421_v9 = vld [vmem:[%s542_s3 + $0x28] sm:$0xff]   ;;  %v58_v11 = vunpack.c.l.s4 %v429_v10  ;;  %v416_v13 = vld [vmem:[%s540_s1 + $0x10] sm:$0xff]   ;;  %v61_v16 = vshrl.u32 %v60_v12, 7 }
   0x6   :  { %370 = vmatprep.subr.bf16.mxu0 %v427_v2  ;;  %404 = vmatprep.mubr.msk.bf16.mxu1 %vm428_vm0, %v427_v2  ;;  %v422_v14 = vld [vmem:[%s542_s3 + $0x20] sm:$0xff]   ;;  %v417_v17 = vld [vmem:[%s540_s1 + $0x8] sm:$0xff]   ;;  %v423_v20 = vld [vmem:[%s542_s3 + $0x18] sm:$0xff]  }
   0x7   :  { %389 = vmatpush3.bf16.msra.mxu1 %v419_v5  ;;  %v59_v15 = vunpack.c.0.s8 %v58_v11  ;;  %v29_v18 = vld [vmem:[%s539_s0] sm:$0x3]  ;;  %v30_v19 = vld [vmem:[%s539_s0 + $0x2] sm:$0x3]  ;;  %v424_v24 = vld [vmem:[%s542_s3 + $0x10] sm:$0xff]  }
   0x8   :  { %390 = vmatprep.subr.bf16.mxu1 %v427_v2  ;;  %v56_v21 = vcombine.low %v29_v18, %v30_v19  ;;  %v418_v23 = vld [vmem:[%s540_s1] sm:$0xff]   ;;  %v425_v26 = vld [vmem:[%s542_s3 + $0x8] sm:$0xff]  }
   0x9   :  { %371 = vmatpush3.bf16.msra.mxu0 %v412_v3  ;;  %v62_v22 = vsub.s32 %v59_v15, %v61_v16  ;;  %v426_v27 = vld [vmem:[%s542_s3] sm:$0xff]  }
   0xa   :  { %372 = vmatprep.subr.bf16.mxu0 %v427_v2  ;;  %v330_v28 = vld [vmem:[%s541_s2] ss:$0 sm:$0xff] }
   0xb   :  { %391 = vmatpush3.bf16.msra.mxu1 %v420_v7  ;;  %v63_v25 = vrot.slane %v56_v21, %v62_v22  ;;  %v339_v36 = vld [vmem:[%s543_s4] ss:$0 sm:$0xff] }
   0xc   :  { %392 = vmatprep.subr.bf16.mxu1 %v427_v2  ;;  %v348_v40 = vld [vmem:[%s544_s5] ss:$0 sm:$0xff] }
   0xd   :  { %373 = vmatpush3.bf16.msra.mxu0 %v413_v4  ;;  %v349_v46 = vld [vmem:[#allocation2] ss:$0 sm:$0xff] }
   0xe   :  { %374 = vmatprep.subr.bf16.mxu0 %v427_v2 }
   0xf   :  { %393 = vmatpush3.bf16.msra.mxu1 %v421_v9 }
  0x10   :  { %394 = vmatprep.subr.bf16.mxu1 %v427_v2 }
  0x11   :  { %375 = vmatpush3.bf16.msra.mxu0 %v414_v6 }
  0x12   :  { %376 = vmatprep.subr.bf16.mxu0 %v427_v2 }
  0x13   :  { %395 = vmatpush3.bf16.msra.mxu1 %v422_v14 }
  0x14   :  { %396 = vmatprep.subr.bf16.mxu1 %v427_v2 }
  0x15   :  { %377 = vmatpush3.bf16.msra.mxu0 %v415_v8 }
  0x16   :  { %378 = vmatprep.subr.bf16.mxu0 %v427_v2 }
  0x17   :  { %397 = vmatpush3.bf16.msra.mxu1 %v423_v20 }
  0x18   :  { %398 = vmatprep.subr.bf16.mxu1 %v427_v2 }
  0x19   :  { %379 = vmatpush3.bf16.msra.mxu0 %v416_v13 }
  0x1a   :  { %380 = vmatprep.subr.bf16.mxu0 %v427_v2 }
  0x1b   :  { %399 = vmatpush3.bf16.msra.mxu1 %v424_v24 }
  0x1c   :  { %400 = vmatprep.subr.bf16.mxu1 %v427_v2 }
  0x1d   :  { %381 = vmatpush3.bf16.msra.mxu0 %v417_v17 }
  0x1e   :  { %382 = vmatprep.subr.bf16.mxu0 %v427_v2 }
  0x1f   :  { %401 = vmatpush3.bf16.msra.mxu1 %v425_v26 }
  0x20   :  { %402 = vmatprep.subr.bf16.mxu1 %v427_v2 }
  0x21   :  { %383 = vmatpush3.bf16.msra.mxu0 %v418_v23 }
  0x23   :  { %403 = vmatpush3.bf16.msra.mxu1 %v426_v27 }
  0x24   :  { %385 = vmatmul.mubr.bf16.vlgmr.msra.gmra.mxu0 %v63_v25 }
  0xe4   :  { %v147_v29 = vpop.f32.mrf.mxu0 }
  0xe5   :  { %v148_v30 = vadd.f32 %v330_v28, %v147_v29 }
  0xe6   :  { %v386_v31 = vpop.f32.mrf.mxu0 }
  0xe7   :  { %v153_v32 = vmax.f32 %v148_v30, 0.0 }
  0xe8   :  { %v150_v33 = vpop.f32.mrf.mxu0 }
  0xe9   :  { %v154_v34 = vpack.c.bf16 %v153_v32, %v153_v32 }
  0xea   :  { %v387_v35 = vpop.f32.mrf.mxu0 }
  0xeb   :  { %405 = vmatmul.mubr.bf16.vlgmr.msra.gmra.mxu1 %v154_v34 }
 0x1ab   :  { %v260_v37 = vpop.f32.mrf.mxu1 }
 0x1ac   :  { %v261_v38 = vadd.f32 %v339_v36, %v260_v37 }
 0x1ad   :  { %v406_v39 = vpop.f32.mrf.mxu1 }
 0x1ae   :  { %v266_v41 = vmax.f32 %v261_v38, 0.0 }
 0x1af   :  { %v263_v42 = vpop.f32.mrf.mxu1 }
 0x1b0   :  { %v274_v43 = vmul.f32 %v348_v40, %v266_v41 }
 0x1b1   :  { %v407_v44 = vpop.f32.mrf.mxu1 }
 0x1b2   :  { %v276_v45 = vsel %vm275_vm1, %v274_v43, 0.0 }
 0x1b3   :  { %277 = vadd.xlane.f32.xlu0 %v276_v45 }
 0x23c   :  { %v278_v47 = vpop.xlane.xlu0 %277 }
 0x23d   :  { %v286_v48 = vadd.f32 %v349_v46, %v278_v47 }
 0x23f   :  { %288 = vst.msk [vmem:[#allocation3] sm:$0xff] %vm287_vm2, %v286_v48 }
 0x246   :  { %v307_v49 = vld [vmem:[#allocation3] sm:$0xf] }
 0x247   :  { %308 = vst [vmem:[%s546_s7] sm:$0xf] %v307_v49 }

</bundles_post_ra>
